<compile_context>
chip_gen: v7x
topology: tpu7x:2x2x1
jax: 0.10.0
libtpu: 0.0.40
codegen_flags: <defaults>
</compile_context>

<pallas_src>
import jax
import jax.numpy as jnp
from jax.experimental import pallas as pl
from jax.experimental.pallas import tpu as pltpu


_VPU_SEQ_THRESHOLD = 16      # below this, the first contraction runs on the VPU
_MASK_NARROW_SEQ_THRESHOLD = 128  # below this, ship the mask as f32, not int8


def gcn_kernel(mask_ref, hidden_ref, wt_ref, out_ref):
    """One grid step processes bb batch elements.

    mask_ref:   (bb, S, S)  f32 (small S) or narrow source dtype (large S)
    hidden_ref: (bb, S, H)  bf16
    wt_ref:     (H, H)      fc1.weight.T, bf16 (pre-transposed in the wrapper)
    out_ref:    (bb, 1, H)
    """
    bb, S, H = hidden_ref.shape
    wt = wt_ref[...]                                   # (H, H) = W.T, bf16

    if S <= _VPU_SEQ_THRESHOLD:
        # Tiny first contraction: an (S,S)@(S,H) matmul with S<=16 fills <4%
        # of the MXU, so keep it on the otherwise-idle VPU, accumulated in f32.
        m = mask_ref[...].astype(jnp.float32)          # (bb, S, S) normed_mask
        h = hidden_ref[...].astype(jnp.float32)        # (bb, S, H)
        t = jnp.zeros((bb, S, H), dtype=jnp.float32)
        for j in range(S):                             # static unroll, S small
            t = t + m[:, :, j:j + 1] * h[:, j:j + 1, :]
    else:
        # Large S: batched bf16 MXU matmul with f32 accumulation.
        m = mask_ref[...].astype(jnp.bfloat16)
        h = hidden_ref[...].astype(jnp.bfloat16)
        t = jnp.einsum("bij,bjh->bih", m, h,
                       preferred_element_type=jnp.float32)

    # Second matmul fused across the whole block: one (bb*S, H) @ (H, H) bf16
    # MXU op with f32 accumulation.  The reshape is a free leading-dim
    # collapse (no relayout) whenever S % 8 == 0; the 2-D dot form is kept as
    # the Mosaic-safe lowering path.
    y = jnp.dot(t.reshape(bb * S, H).astype(jnp.bfloat16), wt,
                preferred_element_type=jnp.float32)
    out = jnp.tanh(y).reshape(bb, S, H)                # (bb, S, H), f32

    # (outputs != 0).sum(dim=1) and outputs.sum(dim=1): reduce over seq, f32.
    nozero = jnp.sum((out != 0.0).astype(jnp.float32), axis=1, keepdims=True)
    ssum = jnp.sum(out, axis=1, keepdims=True)         # (bb, 1, H)
    # Matches torch: division by zero -> inf/NaN if a column is all-zero.
    out_ref[...] = (ssum / nozero).astype(out_ref.dtype)


def _choose_block_batch(B, S, H, mask_itemsize, out_itemsize, budget_bytes, max_bb):
    """Largest divisor of B (<= max_bb) whose per-step VMEM footprint fits."""
    best = 1
    for bb in range(1, max(1, max_bb) + 1):
        if B % bb:
            continue
        # Pipelined blocks (double-buffered mask / hidden / output).
        blocks = 2 * (bb * S * S * mask_itemsize          # mask block
                      + bb * S * H * 2                    # hidden block (bf16)
                      + bb * H * out_itemsize)            # output block
        weight = 2 * H * H * 2                            # bf16 W.T (worst case 2 bufs)
        # f32 temporaries (m, h, t, y, tanh) + bf16 copy of t.
        temps = (bb * S * S * 4 + 4 * bb * S * H * 4
                 + bb * S * H * 2 + 4 * bb * H * 4)
        # Keep a 25% margin below the budget (review item: don't undercount).
        if (blocks + weight + temps) * 5 // 4 <= budget_bytes:
            best = bb
    return best


def gcn_network2(hidden, mask_matrix, fc1_weight):
    """hidden: (B, S, H); mask_matrix: (B, S, S) any numeric dtype;
    fc1_weight: (H, H) in nn.Linear (out, in) convention (y = x @ W.T).
    Returns (B, H) in hidden's dtype."""
    B, S, H = hidden.shape
    assert mask_matrix.shape == (B, S, S)
    assert fc1_weight.shape == (H, H)
    out_dtype = hidden.dtype

    # Generation-aware VMEM sizing (128 MiB on v5e/v6e, 64 MiB on v7x).
    try:
        vmem_cap = int(pltpu.get_tpu_info().vmem_capacity_bytes)
    except Exception:
        vmem_cap = 64 * 1024 * 1024          # conservative (v7x per-core) default
    budget_bytes = (vmem_cap * 3) // 8       # ~48 MiB on 128 MiB chips, ~24 MiB on v7x
    vmem_limit = (vmem_cap * 3) // 4         # ~96 MiB / ~48 MiB scoped limit

    # Operand prep (one-time XLA work, outside the kernel):
    #  * weight pre-transposed and shipped bf16 (MXU-native, half the DMA bytes)
    #  * hidden shipped bf16 (half the DMA bytes; matmuls accumulate in f32)
    #  * mask kept narrow only when S is large enough for the DMA saving to
    #    beat the int8 (32,128) VMEM tile padding / unpack cost.
    w_t = jnp.asarray(fc1_weight).T.astype(jnp.bfloat16)
    hidden_in = hidden.astype(jnp.bfloat16)
    if S >= _MASK_NARROW_SEQ_THRESHOLD:
        mask_in = mask_matrix
    else:
        mask_in = mask_matrix.astype(jnp.float32)

    # Keep at least 2 grid steps so v7x's two TensorCores both get work
    # (neutral on single-core v5e/v6e).
    max_bb = B // 2 if B >= 2 else B
    bb = _choose_block_batch(B, S, H, mask_in.dtype.itemsize,
                             jnp.dtype(out_dtype).itemsize, budget_bytes, max_bb)
    grid = (B // bb,)

    # Output is kept (B, 1, H) so the block's trailing two dims are full-extent
    # (Mosaic-friendly for any bb); squeezed back to (B, H) below.
    # Note: for H < 128 a lane-dense (B/g, g*H) output view would avoid masked
    # vst.msk stores, but it needs g | B and an in-kernel sublane->lane
    # relayout, so it is intentionally not done here.
    def _run(single_buffer_weight):
        if single_buffer_weight:
            # Constant-index weight block: double-buffering it only wastes an
            # extra HxH VMEM buffer, so request a single buffer.
            w_spec = pl.BlockSpec((H, H), lambda b: (0, 0),
                                  pipeline_mode=pl.Buffered(1))
        else:
            w_spec = pl.BlockSpec((H, H), lambda b: (0, 0))
        return pl.pallas_call(
            gcn_kernel,
            out_shape=jax.ShapeDtypeStruct((B, 1, H), out_dtype),
            grid_spec=pltpu.PrefetchScalarGridSpec(
                num_scalar_prefetch=0,
                grid=grid,
                in_specs=[
                    pl.BlockSpec((bb, S, S), lambda b: (b, 0, 0)),
                    pl.BlockSpec((bb, S, H), lambda b: (b, 0, 0)),
                    w_spec,
                ],
                out_specs=pl.BlockSpec((bb, 1, H), lambda b: (b, 0, 0)),
            ),
            compiler_params=pltpu.CompilerParams(
                dimension_semantics=("parallel",),
                vmem_limit_bytes=int(vmem_limit),
            ),
        )(mask_in, hidden_in, w_t)

    try:
        result = _run(True)
    except Exception:
        # Fallback for JAX versions where pipeline_mode / pl.Buffered is not
        # supported on the top-level grid pipeline.
        result = _run(False)
    return result.reshape(B, H)


def gcn_network2_ref(hidden, mask_matrix, fc1_weight):
    """Pure-JAX reference mirroring the PyTorch forward (with the same bf16
    MXU-feed rounding that the kernel applies)."""
    m = mask_matrix.astype(jnp.float32)
    h = hidden.astype(jnp.bfloat16).astype(jnp.float32)
    w = fc1_weight.astype(jnp.bfloat16).astype(jnp.float32)
    t = jnp.einsum("bsk,bkh->bsh", m, h)
    y = jnp.einsum("bsh,oh->bso", t.astype(jnp.bfloat16).astype(jnp.float32), w)
    out = jnp.tanh(y)
    nozero = jnp.sum((out != 0).astype(jnp.float32), axis=1)
    ssum = jnp.sum(out, axis=1)
    return (ssum / nozero).astype(hidden.dtype)


if __name__ == "__main__":
    B, S, H = 2, 8, 32  # batch, seq, hidden_size

    key = jax.random.PRNGKey(0)
    k_hidden, k_mask, k_w = jax.random.split(key, 3)

    hidden = jax.random.normal(k_hidden, (B, S, H), dtype=jnp.float32)
    # Binary adjacency / mask matrix (mirrors torch's mask_matrix.float()).
    mask_matrix = (jax.random.uniform(k_mask, (B, S, S)) > 0.5).astype(jnp.int8)
    # fc1 weight, nn.Linear(H, H, bias=False), (out, in) layout.
    fc1_weight = jax.random.normal(k_w, (H, H), dtype=jnp.float32) * 0.1

    out = gcn_network2(hidden, mask_matrix, fc1_weight)
    out = jax.block_until_ready(out)

    ref = gcn_network2_ref(hidden, mask_matrix, fc1_weight)
    assert out.shape == (B, H)
    # Tolerance covers the bf16 MXU-feed rounding (values are O(0.1 - 1)).
    assert jnp.allclose(out, ref, atol=2e-2, rtol=2e-2), "mismatch vs reference"

    print("KERNEL_OK")
</pallas_src>

<mosaic_0001>
module attributes {stable_mosaic.version = 11 : i64} {
  func.func @gcn_kernel(%arg0: i32, %arg1: memref<1x8x8xf32, #tpu.memory_space<vmem>>, %arg2: memref<1x8x32xbf16, #tpu.memory_space<vmem>>, %arg3: memref<32x32xbf16, #tpu.memory_space<vmem>>, %arg4: memref<1x1x32xf32, #tpu.memory_space<vmem>>) attributes {dimension_semantics = [#tpu.dimension_semantics<parallel>], iteration_bounds = array<i64: 2>, scalar_prefetch = 0 : i64, scratch_operands = 0 : i64, tpu.core_type = #tpu.core_type<tc>, window_params = [{transform_indices = @transform_0, window_bounds = array<i64: 1, 8, 8>}, {transform_indices = @transform_1, window_bounds = array<i64: 1, 8, 32>}, {pipeline_mode = #tpu.pipeline_mode<synchronous>, transform_indices = @transform_2, window_bounds = array<i64: 32, 32>}, {transform_indices = @transform_3, window_bounds = array<i64: 1, 1, 32>}]} {
    %c0 = arith.constant 0 : index
    %c0_0 = arith.constant 0 : index
    %0 = vector.load %arg3[%c0, %c0_0] : memref<32x32xbf16, #tpu.memory_space<vmem>>, vector<32x32xbf16>
    %c0_1 = arith.constant 0 : index
    %c0_2 = arith.constant 0 : index
    %c0_3 = arith.constant 0 : index
    %1 = vector.load %arg1[%c0_1, %c0_2, %c0_3] : memref<1x8x8xf32, #tpu.memory_space<vmem>>, vector<1x8x8xf32>
    %c0_4 = arith.constant 0 : index
    %c0_5 = arith.constant 0 : index
    %c0_6 = arith.constant 0 : index
    %2 = vector.load %arg2[%c0_4, %c0_5, %c0_6] : memref<1x8x32xbf16, #tpu.memory_space<vmem>>, vector<1x8x32xbf16>
    %3 = arith.extf %2 : vector<1x8x32xbf16> to vector<1x8x32xf32>
    %cst = arith.constant 0.000000e+00 : f32
    %4 = vector.broadcast %cst : f32 to vector<1x8x32xf32>
    %5 = vector.extract_strided_slice %1 {offsets = [0, 0, 0], sizes = [1, 8, 1], strides = [1, 1, 1]} : vector<1x8x8xf32> to vector<1x8x1xf32>
    %6 = vector.extract_strided_slice %3 {offsets = [0, 0, 0], sizes = [1, 1, 32], strides = [1, 1, 1]} : vector<1x8x32xf32> to vector<1x1x32xf32>
    %7 = vector.broadcast %5 : vector<1x8x1xf32> to vector<1x8x32xf32>
    %8 = vector.broadcast %6 : vector<1x1x32xf32> to vector<1x8x32xf32>
    %9 = arith.mulf %7, %8 : vector<1x8x32xf32>
    %10 = arith.addf %4, %9 : vector<1x8x32xf32>
    %11 = vector.extract_strided_slice %1 {offsets = [0, 0, 1], sizes = [1, 8, 1], strides = [1, 1, 1]} : vector<1x8x8xf32> to vector<1x8x1xf32>
    %12 = vector.extract_strided_slice %3 {offsets = [0, 1, 0], sizes = [1, 1, 32], strides = [1, 1, 1]} : vector<1x8x32xf32> to vector<1x1x32xf32>
    %13 = vector.broadcast %11 : vector<1x8x1xf32> to vector<1x8x32xf32>
    %14 = vector.broadcast %12 : vector<1x1x32xf32> to vector<1x8x32xf32>
    %15 = arith.mulf %13, %14 : vector<1x8x32xf32>
    %16 = arith.addf %10, %15 : vector<1x8x32xf32>
    %17 = vector.extract_strided_slice %1 {offsets = [0, 0, 2], sizes = [1, 8, 1], strides = [1, 1, 1]} : vector<1x8x8xf32> to vector<1x8x1xf32>
    %18 = vector.extract_strided_slice %3 {offsets = [0, 2, 0], sizes = [1, 1, 32], strides = [1, 1, 1]} : vector<1x8x32xf32> to vector<1x1x32xf32>
    %19 = vector.broadcast %17 : vector<1x8x1xf32> to vector<1x8x32xf32>
    %20 = vector.broadcast %18 : vector<1x1x32xf32> to vector<1x8x32xf32>
    %21 = arith.mulf %19, %20 : vector<1x8x32xf32>
    %22 = arith.addf %16, %21 : vector<1x8x32xf32>
    %23 = vector.extract_strided_slice %1 {offsets = [0, 0, 3], sizes = [1, 8, 1], strides = [1, 1, 1]} : vector<1x8x8xf32> to vector<1x8x1xf32>
    %24 = vector.extract_strided_slice %3 {offsets = [0, 3, 0], sizes = [1, 1, 32], strides = [1, 1, 1]} : vector<1x8x32xf32> to vector<1x1x32xf32>
    %25 = vector.broadcast %23 : vector<1x8x1xf32> to vector<1x8x32xf32>
    %26 = vector.broadcast %24 : vector<1x1x32xf32> to vector<1x8x32xf32>
    %27 = arith.mulf %25, %26 : vector<1x8x32xf32>
    %28 = arith.addf %22, %27 : vector<1x8x32xf32>
    %29 = vector.extract_strided_slice %1 {offsets = [0, 0, 4], sizes = [1, 8, 1], strides = [1, 1, 1]} : vector<1x8x8xf32> to vector<1x8x1xf32>
    %30 = vector.extract_strided_slice %3 {offsets = [0, 4, 0], sizes = [1, 1, 32], strides = [1, 1, 1]} : vector<1x8x32xf32> to vector<1x1x32xf32>
    %31 = vector.broadcast %29 : vector<1x8x1xf32> to vector<1x8x32xf32>
    %32 = vector.broadcast %30 : vector<1x1x32xf32> to vector<1x8x32xf32>
    %33 = arith.mulf %31, %32 : vector<1x8x32xf32>
    %34 = arith.addf %28, %33 : vector<1x8x32xf32>
    %35 = vector.extract_strided_slice %1 {offsets = [0, 0, 5], sizes = [1, 8, 1], strides = [1, 1, 1]} : vector<1x8x8xf32> to vector<1x8x1xf32>
    %36 = vector.extract_strided_slice %3 {offsets = [0, 5, 0], sizes = [1, 1, 32], strides = [1, 1, 1]} : vector<1x8x32xf32> to vector<1x1x32xf32>
    %37 = vector.broadcast %35 : vector<1x8x1xf32> to vector<1x8x32xf32>
    %38 = vector.broadcast %36 : vector<1x1x32xf32> to vector<1x8x32xf32>
    %39 = arith.mulf %37, %38 : vector<1x8x32xf32>
    %40 = arith.addf %34, %39 : vector<1x8x32xf32>
    %41 = vector.extract_strided_slice %1 {offsets = [0, 0, 6], sizes = [1, 8, 1], strides = [1, 1, 1]} : vector<1x8x8xf32> to vector<1x8x1xf32>
    %42 = vector.extract_strided_slice %3 {offsets = [0, 6, 0], sizes = [1, 1, 32], strides = [1, 1, 1]} : vector<1x8x32xf32> to vector<1x1x32xf32>
    %43 = vector.broadcast %41 : vector<1x8x1xf32> to vector<1x8x32xf32>
    %44 = vector.broadcast %42 : vector<1x1x32xf32> to vector<1x8x32xf32>
    %45 = arith.mulf %43, %44 : vector<1x8x32xf32>
    %46 = arith.addf %40, %45 : vector<1x8x32xf32>
    %47 = vector.extract_strided_slice %1 {offsets = [0, 0, 7], sizes = [1, 8, 1], strides = [1, 1, 1]} : vector<1x8x8xf32> to vector<1x8x1xf32>
    %48 = vector.extract_strided_slice %3 {offsets = [0, 7, 0], sizes = [1, 1, 32], strides = [1, 1, 1]} : vector<1x8x32xf32> to vector<1x1x32xf32>
    %49 = vector.broadcast %47 : vector<1x8x1xf32> to vector<1x8x32xf32>
    %50 = vector.broadcast %48 : vector<1x1x32xf32> to vector<1x8x32xf32>
    %51 = arith.mulf %49, %50 : vector<1x8x32xf32>
    %52 = arith.addf %46, %51 : vector<1x8x32xf32>
    %53 = vector.shape_cast %52 : vector<1x8x32xf32> to vector<8x32xf32>
    %54 = arith.truncf %53 : vector<8x32xf32> to vector<8x32xbf16>
    %cst_7 = arith.constant dense<0.000000e+00> : vector<8x32xf32>
    %55 = tpu.matmul %54, %0, %cst_7 {dimension_numbers = #tpu.dot_dimension_numbers<[1], [0], [0], [1], [0, 0, 1, 1], [], []>} : vector<8x32xbf16>, vector<32x32xbf16>, vector<8x32xf32> -> vector<8x32xf32>
    %56 = math.tanh %55 : vector<8x32xf32>
    %57 = vector.shape_cast %56 : vector<8x32xf32> to vector<1x8x32xf32>
    %cst_8 = arith.constant 0.000000e+00 : f32
    %58 = vector.broadcast %cst_8 : f32 to vector<1x8x32xf32>
    %59 = arith.cmpf one, %57, %58 : vector<1x8x32xf32>
    %60 = arith.extui %59 : vector<1x8x32xi1> to vector<1x8x32xi32>
    %61 = arith.sitofp %60 : vector<1x8x32xi32> to vector<1x8x32xf32>
    %cst_9 = arith.constant dense<0.000000e+00> : vector<1x32xf32>
    %62 = vector.multi_reduction <add>, %61, %cst_9 [1] : vector<1x8x32xf32> to vector<1x32xf32>
    %63 = vector.shape_cast %62 : vector<1x32xf32> to vector<1x1x32xf32>
    %cst_10 = arith.constant dense<0.000000e+00> : vector<1x32xf32>
    %64 = vector.multi_reduction <add>, %57, %cst_10 [1] : vector<1x8x32xf32> to vector<1x32xf32>
    %65 = vector.shape_cast %64 : vector<1x32xf32> to vector<1x1x32xf32>
    %66 = arith.divf %65, %63 : vector<1x1x32xf32>
    %c0_11 = arith.constant 0 : index
    %c0_12 = arith.constant 0 : index
    %c0_13 = arith.constant 0 : index
    %67 = vector.load %arg4[%c0_11, %c0_12, %c0_13] : memref<1x1x32xf32, #tpu.memory_space<vmem>>, vector<1x1x32xf32>
    tpu.vector_store %arg4[%c0_11, %c0_12, %c0_13], %66 {strides = array<i32>} : memref<1x1x32xf32, #tpu.memory_space<vmem>>, vector<1x1x32xf32>,
    return
  }
  func.func @transform_0(%arg0: i32) -> (i32, i32, i32) {
    %c0_i32 = arith.constant 0 : i32
    %c0_i32_0 = arith.constant 0 : i32
    %c0_i32_1 = arith.constant 0 : i32
    return %arg0, %c0_i32, %c0_i32_0 : i32, i32, i32
  }
  func.func @transform_1(%arg0: i32) -> (i32, i32, i32) {
    %c0_i32 = arith.constant 0 : i32
    %c0_i32_0 = arith.constant 0 : i32
    %c0_i32_1 = arith.constant 0 : i32
    return %arg0, %c0_i32, %c0_i32_0 : i32, i32, i32
  }
  func.func @transform_2(%arg0: i32) -> (i32, i32) {
    %c0_i32 = arith.constant 0 : i32
    %c0_i32_0 = arith.constant 0 : i32
    %c0_i32_1 = arith.constant 0 : i32
    return %c0_i32, %c0_i32_0 : i32, i32
  }
  func.func @transform_3(%arg0: i32) -> (i32, i32, i32) {
    %c0_i32 = arith.constant 0 : i32
    %c0_i32_0 = arith.constant 0 : i32
    %c0_i32_1 = arith.constant 0 : i32
    return %arg0, %c0_i32, %c0_i32_0 : i32, i32, i32
  }
}

module attributes {stable_mosaic.version = 11 : i64} {
  func.func @gcn_kernel(%arg0: i32, %arg1: memref<1x8x8xf32, #tpu.memory_space<vmem>>, %arg2: memref<1x8x32xbf16, #tpu.memory_space<vmem>>, %arg3: memref<32x32xbf16, #tpu.memory_space<vmem>>, %arg4: memref<1x1x32xf32, #tpu.memory_space<vmem>>) attributes {dimension_semantics = [#tpu.dimension_semantics<parallel>], iteration_bounds = array<i64: 2>, scalar_prefetch = 0 : i64, scratch_operands = 0 : i64, tpu.core_type = #tpu.core_type<tc>, window_params = [{transform_indices = @transform_0, window_bounds = array<i64: 1, 8, 8>}, {transform_indices = @transform_1, window_bounds = array<i64: 1, 8, 32>}, {pipeline_mode = #tpu.pipeline_mode<synchronous>, transform_indices = @transform_2, window_bounds = array<i64: 32, 32>}, {transform_indices = @transform_3, window_bounds = array<i64: 1, 1, 32>}]} {
    %c0 = arith.constant 0 : index
    %c0_0 = arith.constant 0 : index
    %0 = vector.load %arg3[%c0, %c0_0] : memref<32x32xbf16, #tpu.memory_space<vmem>>, vector<32x32xbf16>
    %c0_1 = arith.constant 0 : index
    %c0_2 = arith.constant 0 : index
    %c0_3 = arith.constant 0 : index
    %1 = vector.load %arg1[%c0_1, %c0_2, %c0_3] : memref<1x8x8xf32, #tpu.memory_space<vmem>>, vector<1x8x8xf32>
    %c0_4 = arith.constant 0 : index
    %c0_5 = arith.constant 0 : index
    %c0_6 = arith.constant 0 : index
    %2 = vector.load %arg2[%c0_4, %c0_5, %c0_6] : memref<1x8x32xbf16, #tpu.memory_space<vmem>>, vector<1x8x32xbf16>
    %3 = arith.extf %2 : vector<1x8x32xbf16> to vector<1x8x32xf32>
    %cst = arith.constant 0.000000e+00 : f32
    %4 = vector.broadcast %cst : f32 to vector<1x8x32xf32>
    %5 = vector.extract_strided_slice %1 {offsets = [0, 0, 0], sizes = [1, 8, 1], strides = [1, 1, 1]} : vector<1x8x8xf32> to vector<1x8x1xf32>
    %6 = vector.extract_strided_slice %3 {offsets = [0, 0, 0], sizes = [1, 1, 32], strides = [1, 1, 1]} : vector<1x8x32xf32> to vector<1x1x32xf32>
    %7 = vector.broadcast %5 : vector<1x8x1xf32> to vector<1x8x32xf32>
    %8 = vector.broadcast %6 : vector<1x1x32xf32> to vector<1x8x32xf32>
    %9 = arith.mulf %7, %8 : vector<1x8x32xf32>
    %10 = arith.addf %4, %9 : vector<1x8x32xf32>
    %11 = vector.extract_strided_slice %1 {offsets = [0, 0, 1], sizes = [1, 8, 1], strides = [1, 1, 1]} : vector<1x8x8xf32> to vector<1x8x1xf32>
    %12 = vector.extract_strided_slice %3 {offsets = [0, 1, 0], sizes = [1, 1, 32], strides = [1, 1, 1]} : vector<1x8x32xf32> to vector<1x1x32xf32>
    %13 = vector.broadcast %11 : vector<1x8x1xf32> to vector<1x8x32xf32>
    %14 = vector.broadcast %12 : vector<1x1x32xf32> to vector<1x8x32xf32>
    %15 = arith.mulf %13, %14 : vector<1x8x32xf32>
    %16 = arith.addf %10, %15 : vector<1x8x32xf32>
    %17 = vector.extract_strided_slice %1 {offsets = [0, 0, 2], sizes = [1, 8, 1], strides = [1, 1, 1]} : vector<1x8x8xf32> to vector<1x8x1xf32>
    %18 = vector.extract_strided_slice %3 {offsets = [0, 2, 0], sizes = [1, 1, 32], strides = [1, 1, 1]} : vector<1x8x32xf32> to vector<1x1x32xf32>
    %19 = vector.broadcast %17 : vector<1x8x1xf32> to vector<1x8x32xf32>
    %20 = vector.broadcast %18 : vector<1x1x32xf32> to vector<1x8x32xf32>
    %21 = arith.mulf %19, %20 : vector<1x8x32xf32>
    %22 = arith.addf %16, %21 : vector<1x8x32xf32>
    %23 = vector.extract_strided_slice %1 {offsets = [0, 0, 3], sizes = [1, 8, 1], strides = [1, 1, 1]} : vector<1x8x8xf32> to vector<1x8x1xf32>
    %24 = vector.extract_strided_slice %3 {offsets = [0, 3, 0], sizes = [1, 1, 32], strides = [1, 1, 1]} : vector<1x8x32xf32> to vector<1x1x32xf32>
    %25 = vector.broadcast %23 : vector<1x8x1xf32> to vector<1x8x32xf32>
    %26 = vector.broadcast %24 : vector<1x1x32xf32> to vector<1x8x32xf32>
    %27 = arith.mulf %25, %26 : vector<1x8x32xf32>
    %28 = arith.addf %22, %27 : vector<1x8x32xf32>
    %29 = vector.extract_strided_slice %1 {offsets = [0, 0, 4], sizes = [1, 8, 1], strides = [1, 1, 1]} : vector<1x8x8xf32> to vector<1x8x1xf32>
    %30 = vector.extract_strided_slice %3 {offsets = [0, 4, 0], sizes = [1, 1, 32], strides = [1, 1, 1]} : vector<1x8x32xf32> to vector<1x1x32xf32>
    %31 = vector.broadcast %29 : vector<1x8x1xf32> to vector<1x8x32xf32>
    %32 = vector.broadcast %30 : vector<1x1x32xf32> to vector<1x8x32xf32>
    %33 = arith.mulf %31, %32 : vector<1x8x32xf32>
    %34 = arith.addf %28, %33 : vector<1x8x32xf32>
    %35 = vector.extract_strided_slice %1 {offsets = [0, 0, 5], sizes = [1, 8, 1], strides = [1, 1, 1]} : vector<1x8x8xf32> to vector<1x8x1xf32>
    %36 = vector.extract_strided_slice %3 {offsets = [0, 5, 0], sizes = [1, 1, 32], strides = [1, 1, 1]} : vector<1x8x32xf32> to vector<1x1x32xf32>
    %37 = vector.broadcast %35 : vector<1x8x1xf32> to vector<1x8x32xf32>
    %38 = vector.broadcast %36 : vector<1x1x32xf32> to vector<1x8x32xf32>
    %39 = arith.mulf %37, %38 : vector<1x8x32xf32>
    %40 = arith.addf %34, %39 : vector<1x8x32xf32>
    %41 = vector.extract_strided_slice %1 {offsets = [0, 0, 6], sizes = [1, 8, 1], strides = [1, 1, 1]} : vector<1x8x8xf32> to vector<1x8x1xf32>
    %42 = vector.extract_strided_slice %3 {offsets = [0, 6, 0], sizes = [1, 1, 32], strides = [1, 1, 1]} : vector<1x8x32xf32> to vector<1x1x32xf32>
    %43 = vector.broadcast %41 : vector<1x8x1xf32> to vector<1x8x32xf32>
    %44 = vector.broadcast %42 : vector<1x1x32xf32> to vector<1x8x32xf32>
    %45 = arith.mulf %43, %44 : vector<1x8x32xf32>
    %46 = arith.addf %40, %45 : vector<1x8x32xf32>
    %47 = vector.extract_strided_slice %1 {offsets = [0, 0, 7], sizes = [1, 8, 1], strides = [1, 1, 1]} : vector<1x8x8xf32> to vector<1x8x1xf32>
    %48 = vector.extract_strided_slice %3 {offsets = [0, 7, 0], sizes = [1, 1, 32], strides = [1, 1, 1]} : vector<1x8x32xf32> to vector<1x1x32xf32>
    %49 = vector.broadcast %47 : vector<1x8x1xf32> to vector<1x8x32xf32>
    %50 = vector.broadcast %48 : vector<1x1x32xf32> to vector<1x8x32xf32>
    %51 = arith.mulf %49, %50 : vector<1x8x32xf32>
    %52 = arith.addf %46, %51 : vector<1x8x32xf32>
    %53 = vector.shape_cast %52 : vector<1x8x32xf32> to vector<8x32xf32>
    %54 = arith.truncf %53 : vector<8x32xf32> to vector<8x32xbf16>
    %cst_7 = arith.constant dense<0.000000e+00> : vector<8x32xf32>
    %55 = tpu.matmul %54, %0, %cst_7 {dimension_numbers = #tpu.dot_dimension_numbers<[1], [0], [0], [1], [0, 0, 1, 1], [], []>} : vector<8x32xbf16>, vector<32x32xbf16>, vector<8x32xf32> -> vector<8x32xf32>
    %56 = math.tanh %55 : vector<8x32xf32>
    %57 = vector.shape_cast %56 : vector<8x32xf32> to vector<1x8x32xf32>
    %cst_8 = arith.constant 0.000000e+00 : f32
    %58 = vector.broadcast %cst_8 : f32 to vector<1x8x32xf32>
    %59 = arith.cmpf one, %57, %58 : vector<1x8x32xf32>
    %60 = arith.extui %59 : vector<1x8x32xi1> to vector<1x8x32xi32>
    %61 = arith.sitofp %60 : vector<1x8x32xi32> to vector<1x8x32xf32>
    %cst_9 = arith.constant dense<0.000000e+00> : vector<1x32xf32>
    %62 = vector.multi_reduction <add>, %61, %cst_9 [1] : vector<1x8x32xf32> to vector<1x32xf32>
    %63 = vector.shape_cast %62 : vector<1x32xf32> to vector<1x1x32xf32>
    %cst_10 = arith.constant dense<0.000000e+00> : vector<1x32xf32>
    %64 = vector.multi_reduction <add>, %57, %cst_10 [1] : vector<1x8x32xf32> to vector<1x32xf32>
    %65 = vector.shape_cast %64 : vector<1x32xf32> to vector<1x1x32xf32>
    %66 = arith.divf %65, %63 : vector<1x1x32xf32>
    %c0_11 = arith.constant 0 : index
    %c0_12 = arith.constant 0 : index
    %c0_13 = arith.constant 0 : index
    %67 = vector.load %arg4[%c0_11, %c0_12, %c0_13] : memref<1x1x32xf32, #tpu.memory_space<vmem>>, vector<1x1x32xf32>
    tpu.vector_store %arg4[%c0_11, %c0_12, %c0_13], %66 {strides = array<i32>} : memref<1x1x32xf32, #tpu.memory_space<vmem>>, vector<1x1x32xf32>,
    return
  }
  func.func @transform_0(%arg0: i32) -> (i32, i32, i32) {
    %c0_i32 = arith.constant 0 : i32
    %c0_i32_0 = arith.constant 0 : i32
    %c0_i32_1 = arith.constant 0 : i32
    return %arg0, %c0_i32, %c0_i32_0 : i32, i32, i32
  }
  func.func @transform_1(%arg0: i32) -> (i32, i32, i32) {
    %c0_i32 = arith.constant 0 : i32
    %c0_i32_0 = arith.constant 0 : i32
    %c0_i32_1 = arith.constant 0 : i32
    return %arg0, %c0_i32, %c0_i32_0 : i32, i32, i32
  }
  func.func @transform_2(%arg0: i32) -> (i32, i32) {
    %c0_i32 = arith.constant 0 : i32
    %c0_i32_0 = arith.constant 0 : i32
    %c0_i32_1 = arith.constant 0 : i32
    return %c0_i32, %c0_i32_0 : i32, i32
  }
  func.func @transform_3(%arg0: i32) -> (i32, i32, i32) {
    %c0_i32 = arith.constant 0 : i32
    %c0_i32_0 = arith.constant 0 : i32
    %c0_i32_1 = arith.constant 0 : i32
    return %arg0, %c0_i32, %c0_i32_0 : i32, i32, i32
  }
}

</mosaic_0001>

<bundles_post_ra>
// kernel: tpu_custom_call.1
= control target key start
LH: loop header
LB: loop body
LE: loop exit
PB: predicated region body
PF: predicated region fallthrough
CT: control target
= control target key end

     0   :  { %8 = vsyncpa [#allocation3], 0  ;;  %s1077_s0 = inlined_call_operand.hbm [shape: f32[2,8,8], index: 0, kind: input, shape index: {}]   ;;  %s1078_s1 = inlined_call_operand.hbm [shape: bf16[2,8,32], index: 1, kind: input, shape index: {}]   ;;  %s1079_s2 = inlined_call_operand.hbm [shape: bf16[32,32], index: 2, kind: input, shape index: {}]   ;;  %s1080_s3 = inlined_call_operand.hbm [shape: f32[2,1,32], index: 3, kind: output, shape index: {}]  }
   0x1   :  { %10 = vsyncpa [#allocation3 + $0x1], 0 }
   0x2   :  { %11 = vsyncpa [#allocation6], 0 }
   0x3   :  { %13 = vsyncpa [#allocation6 + $0x1], 0 }
   0x4   :  { %14 = vsyncpa [#allocation4], 0 }
   0x5   :  { %16 = vsyncpa [#allocation4 + $0x1], 0  ;;  %s834_s12 = smov 0   ;;  %s836_s13 = smov 0  }
   0x6   :  { %s838_s14 = smov 0   ;;  %s840_s15 = smov 0  }
   0x7 LB: > { %s855_s16 = sadd.s32 4294967295, %s796_s15   ;;  %s515_s17 = sadd.s32 4294967294, %s796_s15   ;;  %s796_s15 = sphi %s840_s15, %s1102_s15   ;;  %s792_s14 = sphi %s838_s14, %s1101_s14   ;;  %s788_s13 = sphi %s836_s13, %s1100_s13   ;;  %s784_s12 = sphi %s834_s12, %s1099_s12  }
   0x8   : > { %p42_p0 = scmp.ne.s32.totalorder %s788_s13, %s784_s12  ;;  %p1081_p1 = scmp.eq.s32.totalorder %s855_s16, 0 }
   0x9   : > { %p119_p3 = scmp.eq.s32.totalorder %s515_s17, 1  ;;  %p516_p5 = scmp.ge.s32.totalorder %s796_s15, 1 }
   0xa   : > { %p864_p4 = por %p1081_p1, %p42_p0  ;;  %p126_p7 = scmp.lt.s32.totalorder %s796_s15, 3 }
   0xb   : > { %p869_p6 = por %p119_p3, %p42_p0  ;;  %s798_s21 = smov [#allocation7]  }
   0xc   : > { %s1085_s18 = scalar_select %p864_p4, 1, 0 }
   0xd   : > { %s1086_s19 = scalar_select %p869_p6, 1, 0 }
   0xe   : > { %p874_p8 = pnand %p516_p5, %p126_p7  ;;  %s138_s22 = sshll.u32 %s798_s21, 4  ;;  %s878_s22 = int_to_ptr.vmem [resolvable:$true] %s138_s22 }
   0xf   : > { %s890_s24 = sadd.s32 1, %s796_s15   ;;  %s29_s25 = sadd.s32 1, %s792_s14 }
  0x10   : > { %s1087_s20 = scalar_select %p874_p8, 1, 0 }
  0x11   : > { %p555_p9 = pneg %p874_p8  ;;  %s26_s26 = ssub.s32 %s796_s15, %s890_s24 }
  0x12   : > { %s634_s29 = scalar_lea.hbm %s1079_s2, 256 }
  0x13   : > { %p885_p11 = pnand %p555_p9, %p1081_p1  ;;  %p635_p12 = scmp.ne.s32.totalorder %s1079_s2, %s634_s29 }
  0x14   : > { %p641_p5 = scmp.lt.u32.totalorder %s634_s29, %s1079_s2 }
  0x15   : > { %p636_p13 = pneg %p885_p11 }
  0x17   : > { %p637_p0 = pnand %p636_p13, %p635_p12 }
  0x19   : > { %p638_p3 = pneg %p637_p0 }
  0x1b   : > { %p643_p7 = pnand %p641_p5, %p638_p3 }
  0x1d   : > { %646 = shalt.err (!%p643_p7)
}
  0x1e   : > { %s647_s7 = scalar_lea.vmem %s878_s22, 256  ;;  %p655_p2 = scmp.lt.s32.totalorder %s878_s22, %s878_s22 }
  0x1f   : > { %p648_p9 = scmp.ne.s32.totalorder %s878_s22, %s647_s7  ;;  %p656_p6 = scmp.lt.s32.totalorder %s647_s7, %s647_s7 }
  0x21   : > { %p650_p10 = pnand %p648_p9, %p636_p13  ;;  %p657_p4 = por %p656_p6, %p655_p2 }
  0x23   : > { %p651_p1 = pneg %p650_p10 }
  0x25   : > { %p658_p8 = pnand %p657_p4, %p651_p1 }
  0x27   : > { %661 = shalt.err (!%p658_p8)
}
  0x28   : > { %s799_s8 = smov 64   ;;  %s800_s9 = smov 4  }
  0x29   : > { %558 = dma.hbm_to_vmem [thread:$0]  (!%p885_p11), %s1079_s2, 256, %s878_s22, [#allocation6], %s799_s8, %s799_s8, %s800_s9  }
  0x2a   : > { %p27_p1 = scmp.eq.s32.totalorder %s26_s26, 0  ;;  %p36_p2 = scmp.ne.s32.totalorder %s792_s14, %s788_s13 }
  0x2b   : > { %p37_p4 = scmp.eq.s32.totalorder %s796_s15, 0  ;;  %p571_p6 = scmp.lt.s32.totalorder %s796_s15, 2 }
  0x2c   : > { %s921_s17 = scalar_select %p27_p1, %s792_s14, %s29_s25  }
  0x2d   : > { %p38_p8 = por %p37_p4, %p36_p2  ;;  %p1089_p10 = scmp.eq.s32.totalorder %s855_s16, 1 }
  0x2e   : > { %s930_s27 = sand.u32 1, %s792_s14   ;;  %s520_s23 = sshll.u32 %s796_s15, 7 }
  0x2f   : > { %p925_p12 = por %p1089_p10, %p36_p2  ;;  %s519_s28 = sshll.u32 %s930_s27, 3 }
  0x30   : > { %s937_s26 = scalar_lea.hbm %s1077_s0, %s520_s23  ;;  %s156_s25 = scalar_lea.vmem [#allocation2], %s519_s28 }
  0x31   : > { %s1090_s21 = scalar_select %p925_p12, 1, 0 }
  0x32   : > { %s163_s30 = sshll.u32 %s156_s25, 4  ;;  %p939_p11 = pnand %p571_p6, %p38_p8  ;;  %s943_s30 = int_to_ptr.vmem [resolvable:$true] %s163_s30 }
  0x33   : > { %s170_s5 = sand.u32 1, %s796_s15   ;;  %s153_s6 = scalar_lea.sflag [#allocation3], %s930_s27 }
  0x34   : > { %s662_s7 = scalar_lea.hbm %s937_s26, 128  ;;  %p664_p0 = pneg %p939_p11 }
  0x35   : > { %p663_p13 = scmp.ne.s32.totalorder %s937_s26, %s662_s7  ;;  %s667_s10 = scalar_lea.hbm %s1077_s0, 256 }
  0x36   : > { %p668_p7 = scmp.lt.u32.totalorder %s937_s26, %s1077_s0  ;;  %p669_p9 = scmp.lt.u32.totalorder %s667_s10, %s662_s7 }
  0x37   : > { %p665_p3 = pnand %p664_p0, %p663_p13  ;;  %p671_p2 = scmp.lt.u32.totalorder %s662_s7, %s937_s26 }
  0x38   : > { %p670_p1 = por %p669_p9, %p668_p7 }
  0x39   : > { %p666_p5 = pneg %p665_p3 }
  0x3a   : > { %p672_p4 = por %p671_p2, %p670_p1 }
  0x3c   : > { %p673_p6 = pnand %p672_p4, %p666_p5 }
  0x3e   : > { %676 = shalt.err (!%p673_p6)
}
  0x3f   : > { %s677_s28 = scalar_lea.vmem %s943_s30, 128  ;;  %s801_s22 = smov [#allocation2]  }
  0x40   : > { %p678_p8 = scmp.ne.s32.totalorder %s943_s30, %s677_s28  ;;  %s682_s29 = sshll.u32 %s801_s22, 4  ;;  %s683_s29 = int_to_ptr.vmem [resolvable:$false] %s682_s29 }
  0x41   : > { %s684_s25 = scalar_lea.vmem %s683_s29, 256  ;;  %p685_p3 = scmp.lt.s32.totalorder %s943_s30, %s683_s29 }
  0x42   : > { %p680_p10 = pnand %p678_p8, %p664_p0  ;;  %p686_p7 = scmp.lt.s32.totalorder %s684_s25, %s677_s28 }
  0x44   : > { %p681_p13 = pneg %p680_p10  ;;  %p687_p9 = por %p686_p7, %p685_p3 }
  0x46   : > { %p688_p1 = pnand %p687_p9, %p681_p13 }
  0x48   : > { %691 = shalt.err (!%p688_p1)
}
  0x49   : > { %562 = dma.hbm_to_vmem [thread:$0]  (!%p939_p11), %s937_s26, 128, %s943_s30, %s153_s6  }
  0x4a   : > { %s521_s7 = sshll.u32 %s930_s27, 2  ;;  %s522_s8 = sshll.u32 %s796_s15, 6 }
  0x4b   : > { %s977_s11 = scalar_lea.hbm %s1078_s1, %s522_s8  ;;  %s174_s23 = scalar_lea.vmem [#allocation5], %s521_s7 }
  0x4c   : > { %s181_s28 = sshll.u32 %s174_s23, 4  ;;  %s171_s22 = scalar_lea.sflag [#allocation6], %s170_s5  ;;  %s182_s28 = int_to_ptr.vmem [resolvable:$true] %s181_s28 }
  0x4d   : > { %s692_s29 = scalar_lea.hbm %s977_s11, 64  ;;  %s697_s30 = scalar_lea.hbm %s1078_s1, 128 }
  0x4e   : > { %p693_p5 = scmp.ne.s32.totalorder %s977_s11, %s692_s29  ;;  %p698_p6 = scmp.lt.u32.totalorder %s977_s11, %s1078_s1 }
  0x4f   : > { %p699_p8 = scmp.lt.u32.totalorder %s697_s30, %s692_s29  ;;  %p701_p13 = scmp.lt.u32.totalorder %s692_s29, %s977_s11 }
  0x50   : > { %p695_p2 = pnand %p693_p5, %p664_p0 }
  0x51   : > { %p700_p10 = por %p699_p8, %p698_p6 }
  0x52   : > { %p696_p4 = pneg %p695_p2 }
  0x53   : > { %p702_p3 = por %p701_p13, %p700_p10 }
  0x55   : > { %p703_p7 = pnand %p702_p3, %p696_p4 }
  0x57   : > { %706 = shalt.err (!%p703_p7)
}
  0x58   : > { %s707_s5 = scalar_lea.vmem %s182_s28, 64  ;;  %s802_s7 = smov [#allocation5]  }
  0x59   : > { %p708_p9 = scmp.ne.s32.totalorder %s182_s28, %s707_s5  ;;  %s712_s8 = sshll.u32 %s802_s7, 4  ;;  %s713_s8 = int_to_ptr.vmem [resolvable:$false] %s712_s8 }
  0x5a   : > { %s714_s9 = scalar_lea.vmem %s713_s8, 128  ;;  %p715_p2 = scmp.lt.s32.totalorder %s182_s28, %s713_s8 }
  0x5b   : > { %p710_p1 = pnand %p708_p9, %p664_p0  ;;  %p716_p12 = scmp.lt.s32.totalorder %s714_s9, %s707_s5 }
  0x5d   : > { %p711_p5 = pneg %p710_p1  ;;  %p717_p6 = por %p716_p12, %p715_p2 }
  0x5f   : > { %p718_p8 = pnand %p717_p6, %p711_p5 }
  0x61   : > { %721 = shalt.err (!%p718_p8)
}
  0x62   : > { %565 = dma.hbm_to_vmem [thread:$0]  (!%p939_p11), %s977_s11, 64, %s182_s28, %s171_s22  }
  0x63   : > { %p1092_p4 = scmp.ne.s32.totalorder %s1087_s20, 0 }
  0x64   : > { %s1003_s10 = sand.u32 (!%p1092_p4), 1, %s788_s13   ;;  %p1093_p0 = scmp.ne.s32.totalorder (!%p1092_p4), %s1085_s18, 0 }
  0x65   : > { %190 = sbr.rel (%p1092_p4) target bundleno = 536 (0x218), region = 32  ;;  %s524_s23 = sshll.u32 (!%p1092_p4), %s1003_s10, 3 }
  0x66   : > { %s193_s29 = scalar_lea.sflag (!%p1092_p4), [#allocation3], %s1003_s10  ;;  %s196_s27 = scalar_lea.vmem (!%p1092_p4), [#allocation2], %s524_s23 }
  0x6c   : > { %767 = dma.done.wait (%p1093_p0), %s193_s29, 128  }
  0x6d   : > { %769 = vsyncadd (%p1093_p0), %s193_s29, 4294967168  ;;  %s201_s4 = sand.u32 1, %s855_s16   ;;  %s525_s20 = sshll.u32 %s1003_s10, 2 }
  0x6e   : > { %s202_s11 = scalar_lea.sflag [#allocation6], %s201_s4  ;;  %s1013_s28 = scalar_lea.vmem [#allocation5], %s525_s20 }
  0x6f   : > { %771 = dma.done.wait (%p1093_p0), %s202_s11, 64  }
  0x70   : > { %773 = vsyncadd (%p1093_p0), %s202_s11, 4294967232  ;;  %p1094_p12 = scmp.eq.s32.totalorder %s855_s16, 0 }
  0x72   : > { %775 = dma.done.wait (%p1094_p12), [#allocation6], 256   ;;  %p1095_p11 = pmov %p1094_p12 }
  0x73   : > { %v803_v0 = vmov 2   ;;  %v804_v1 = vmov 0   ;;  %v241_v2 = vld [vmem:[%s196_s27] sm:$0xff]  ;;  %v805_v3 = vmov 3   ;;  %v806_v4 = vmov 1   ;;  %v628_v9 = vld [vmem:[#allocation7] sm:$0xff]  }
  0x74   : > { %777 = vsyncadd (%p1095_p11), [#allocation6], 4294967040  ;;  %621 = vset.pattern.permute.xlu1 %v803_v0  ;;  %619 = vset.pattern.permute.xlu0 %v804_v1  ;;  %v807_v5 = vmov 4   ;;  %v808_v6 = vmov 5   ;;  %v809_v7 = vmov 6   ;;  %v810_v8 = vmov 7  }
  0x75   : > { %266 = vperm.xlu1 %621, %v241_v2   ;;  %246 = vperm.xlu0 %619, %v241_v2   ;;  %v811_v10 = vmov 0.0   ;;  %v629_v11 = vld [vmem:[#allocation7 + $0x8] sm:$0xff]   ;;  %vm812_vm0 = vmmov 0   ;;  %v249_v12 = vlaneseq  ;;  %v242_v14 = vld [vmem:[%s1013_s28] sm:$0xf]  ;;  %vm338_vm1 = vcmask 261120  }
  0x76   : > { %537 = vmatprep.subr.bf16.mxu0 %v811_v10  ;;  %541 = vmatprep.mubr.msk.bf16.mxu0 %vm812_vm0, %v811_v10  ;;  %v243_v17 = vunpack.c.l.bf16 %v242_v14  ;;  %s531_s18 = sshll.u32 %s855_s16, 4  ;;  %s235_s22 = scalar_lea.vmem [#allocation8], %s1003_s10  ;;  %vm402_vm3 = vcmask 253952  }
  0x77   : > { %538 = vmatpush3.bf16.msra.mxu0 %v628_v9  ;;  %v250_v13 = vshrl.u32 %v249_v12, 7  ;;  %s417_s26 = sshll.u32 %s235_s22, 4  ;;  %s1033_s25 = scalar_lea.hbm %s1080_s3, %s531_s18  ;;  %s1035_s26 = int_to_ptr.vmem [resolvable:$true] %s417_s26 }
  0x78   : > { %539 = vmatprep.subr.bf16.mxu0 %v811_v10  ;;  %s405_s5 = scalar_lea.sflag [#allocation4], %s1003_s10  ;;  %s722_s7 = scalar_lea.vmem %s1035_s26, 16 }
  0x79   : > { %622 = vset.pattern.permute.xlu1 %v805_v3  ;;  %620 = vset.pattern.permute.xlu0 %v806_v4  ;;  %v251_v15 = vsub.s32 0, %v250_v13  ;;  %v261_v16 = vsub.s32 1, %v250_v13  ;;  %v271_v18 = vsub.s32 2, %v250_v13  ;;  %v281_v22 = vsub.s32 3, %v250_v13  ;;  %p723_p10 = scmp.ne.s32.totalorder %s1035_s26, %s722_s7  ;;  %p1096_p13 = scmp.ne.s32.totalorder %s1090_s21, 0 }
  0x7a   : > { %276 = vperm.xlu1 %622, %v241_v2   ;;  %256 = vperm.xlu0 %620, %v241_v2   ;;  %v291_v24 = vsub.s32 4, %v250_v13  ;;  %v301_v28 = vsub.s32 5, %v250_v13  ;;  %v311_v36 = vsub.s32 6, %v250_v13  ;;  %v321_v45 = vsub.s32 7, %v250_v13  ;;  %s813_s16 = smov [#allocation8]  }
  0x7b   : > { %540 = vmatpush3.bf16.msra.mxu0 %v629_v11  ;;  %v252_v21 = vrot.slane %v243_v17, %v251_v15  ;;  %v262_v23 = vrot.slane %v243_v17, %v261_v16  ;;  %v272_v25 = vrot.slane %v243_v17, %v271_v18  ;;  %v282_v30 = vrot.slane %v243_v17, %v281_v22  ;;  %p724_p3 = pnand %p723_p10, %p1096_p13  ;;  %s726_s8 = sshll.u32 %s813_s16, 4  ;;  %s727_s8 = int_to_ptr.vmem [resolvable:$false] %s726_s8 }
  0x7c   : > { %v292_v32 = vrot.slane %v243_v17, %v291_v24  ;;  %v302_v35 = vrot.slane %v243_v17, %v301_v28  ;;  %v312_v44 = vrot.slane %v243_v17, %v311_v36  ;;  %v322_v50 = vrot.slane %v243_v17, %v321_v45  ;;  %s728_s9 = scalar_lea.vmem %s727_s8, 32  ;;  %p729_p9 = scmp.lt.s32.totalorder %s1035_s26, %s727_s8 }
  0x7d   : > { %p725_p7 = pneg %p724_p3  ;;  %p730_p1 = scmp.lt.s32.totalorder %s728_s9, %s722_s7 }
  0x7e   : > { %623 = vset.pattern.permute.xlu1 %v807_v5  ;;  %624 = vset.pattern.permute.xlu0 %v808_v6 }
  0x7f   : > { %286 = vperm.xlu1 %623, %v241_v2   ;;  %296 = vperm.xlu0 %624, %v241_v2   ;;  %p731_p5 = por %p730_p1, %p729_p9 }
  0x81   : > { %p732_p2 = pnand %p731_p5, %p725_p7 }
  0x83   : > { %625 = vset.pattern.permute.xlu1 %v809_v7  ;;  %627 = vset.pattern.permute.xlu0 %v810_v8 }
  0x84   : > { %306 = vperm.xlu1 %625, %v241_v2  }
  0x88   : > { %626 = vset.pattern.permute.xlu1 %v810_v8 }
  0x89   : > { %316 = vperm.xlu1 %626, %v241_v2  }
  0xf4   : > { %v267_v19 = vpop.permute.xlu1 %266  ;;  %v247_v20 = vpop.permute.xlu0 %246 }
  0xf5   : > { %v253_v29 = vmul.f32 %v252_v21, %v247_v20  ;;  %v273_v33 = vmul.f32 %v272_v25, %v267_v19 }
  0xf9   : > { %v277_v26 = vpop.permute.xlu1 %276  ;;  %v257_v27 = vpop.permute.xlu0 %256 }
  0xfa   : > { %v263_v31 = vmul.f32 %v262_v23, %v257_v27  ;;  %v283_v37 = vmul.f32 %v282_v30, %v277_v26 }
  0xfc   : > { %v264_v34 = vadd.f32 %v263_v31, %v253_v29 }
  0xfe   : > { %v274_v38 = vadd.f32 %v273_v33, %v264_v34  ;;  %v287_v39 = vpop.permute.xlu1 %286  ;;  %v297_v40 = vpop.permute.xlu0 %296 }
  0xff   : > { %v293_v41 = vmul.f32 %v292_v32, %v287_v39  ;;  %v303_v43 = vmul.f32 %v302_v35, %v297_v40 }
 0x100   : > { %v284_v42 = vadd.f32 %v283_v37, %v274_v38 }
 0x102   : > { %v294_v46 = vadd.f32 %v293_v41, %v284_v42 }
 0x103   : > { %v307_v47 = vpop.permute.xlu1 %306 }
 0x104   : > { %v304_v48 = vadd.f32 %v303_v43, %v294_v46  ;;  %v313_v49 = vmul.f32 %v312_v44, %v307_v47 }
 0x106   : > { %v314_v52 = vadd.f32 %v313_v49, %v304_v48 }
 0x108   : > { %v317_v51 = vpop.permute.xlu1 %316 }
 0x109   : > { %v323_v53 = vmul.f32 %v322_v50, %v317_v51 }
 0x10b   : > { %v324_v54 = vadd.f32 %v323_v53, %v314_v52 }
 0x10d   : > { %v325_v55 = vpack.c.bf16 %v324_v54, %v324_v54 }
 0x10f   : > { %542 = vmatmul.mubr.msk.bf16.vlgmr.msra.gmra.mrb[0].mxu0 %vm338_vm1, %v325_v55 }
 0x1e2   : > { %v376_v56 = vpop.f32.mrb[0].mxu0 }
 0x1e3   : > { %630 = vtanh.f32 %v376_v56  ;;  %v543_v57 = vpop.f32.mrb[1].mxu0 }
 0x1e4   : > { %v379_v58 = vpop.f32.mrb[2].mxu0 }
 0x1e5   : > { %v544_v59 = vpop.f32.mrb[3].mxu0 }
 0x1ed   : > { %v631_v60 = vpop.eup %630 }
 0x1ee   : > { %vm383_vm2 = vcmp.ne.f32.partialorder %v631_v60, 0.0  ;;  %v393_v62 = vsel %vm338_vm1, %v631_v60, 0.0 }
 0x1ef   : > { %v530_v61 = vsel %vm383_vm2, 1.0, %v811_v10  ;;  %v394_v1 = vrot.slane %v393_v62, 4 }
 0x1f0   : > { %v386_v63 = vsel %vm338_vm1, %v530_v61, 0.0 }
 0x1f1   : > { %v387_v0 = vrot.slane %v386_v63, 4  ;;  %v395_v4 = vadd.f32 %v394_v1, %v393_v62 }
 0x1f3   : > { %v388_v2 = vadd.f32 %v387_v0, %v386_v63  ;;  %v396_v7 = vrot.slane %v395_v4, 2 }
 0x1f5   : > { %v389_v3 = vrot.slane %v388_v2, 2  ;;  %v397_v9 = vadd.f32 %v396_v7, %v395_v4 }
 0x1f7   : > { %v390_v5 = vadd.f32 %v389_v3, %v388_v2  ;;  %v398_v11 = vrot.slane %v397_v9, 1 }
 0x1f9   : > { %v391_v6 = vrot.slane %v390_v5, 1  ;;  %v399_v10 = vadd.f32 %v398_v11, %v397_v9 }
 0x1fb   : > { %v392_v8 = vadd.f32 %v391_v6, %v390_v5 }
 0x1fd   : > { %632 = vrcp.f32 %v392_v8 }
 0x207   : > { %v633_v12 = vpop.eup %632 }
 0x208   : > { %v401_v13 = vmul.f32 %v633_v12, %v399_v10 }
 0x20a   : > { %403 = vst.msk [vmem:[%s235_s22] sm:$0x1] %vm402_vm3, %v401_v13 }
 0x20b   : > { %735 = shalt.err (!%p732_p2)
}
 0x20c   : > { %s736_s10 = scalar_lea.hbm %s1033_s25, 16  ;;  %s740_s27 = scalar_lea.hbm %s1080_s3, 32 }
 0x20d   : > { %p737_p6 = scmp.ne.s32.totalorder %s1033_s25, %s736_s10  ;;  %p741_p0 = scmp.lt.u32.totalorder %s1033_s25, %s1080_s3 }
 0x20e   : > { %p742_p12 = scmp.lt.u32.totalorder %s740_s27, %s736_s10  ;;  %p744_p10 = scmp.lt.u32.totalorder %s736_s10, %s1033_s25 }
 0x20f   : > { %p738_p8 = pnand %p737_p6, %p1096_p13 }
 0x210   : > { %p743_p11 = por %p742_p12, %p741_p0 }
 0x211   : > { %p739_p4 = pneg %p738_p8 }
 0x212   : > { %p745_p3 = por %p744_p10, %p743_p11 }
 0x214   : > { %p746_p7 = pnand %p745_p3, %p739_p4 }
 0x216   : > { %749 = shalt.err (!%p746_p7)
}
 0x217   : > { %553 = dma.vmem_to_hbm [thread:$0]  (%p1096_p13), %s1035_s26, 16, %s1033_s25, %s405_s5  }
 0x218 PF: > { %s429_s11 = sand.u32 1, %s784_s12   ;;  %p1097_p9 = scmp.ne.s32.totalorder %s1086_s19, 0 }
 0x219   : > { %p1098_p1 = scmp.ge.s32.totalorder %s796_s15, 2  ;;  %s430_s28 = scalar_lea.sflag [#allocation4], %s429_s11 }
 0x21b   : > { %p567_p5 = pnand %p1098_p1, %p1097_p9 }
 0x21d   : > { %779 = dma.done.wait (!%p567_p5), %s430_s28, 16  }
 0x21e   : > { %781 = vsyncadd (!%p567_p5), %s430_s28, 4294967280  ;;  %p19_p2 = scmp.ge.s32.totalorder %s890_s24, 4   ;;  %s1099_s12 = smov %s788_s13 }
 0x21f   : > { %s1100_s13 = smov %s792_s14  ;;  %s1101_s14 = smov %s921_s17 }
 0x220   : > { %s1102_s15 = smov %s890_s24  ;;  %21 = sbr.rel (!%p19_p2) target bundleno = 7 (0x7), region = 94 }
 0x227   :  { %434 = vsyncpa [#allocation3], 1 }
 0x228   :  { %436 = vsyncpa [#allocation3 + $0x1], 1 }
 0x229   :  { %437 = vsyncpa [#allocation6], 1 }
 0x22a   :  { %439 = vsyncpa [#allocation6 + $0x1], 1 }
 0x22b   :  { %440 = vsyncpa [#allocation4], 1 }
 0x22c   :  { %442 = vsyncpa [#allocation4 + $0x1], 1 }

// kernel: tpu_custom_call.1
= control target key start
LH: loop header
LB: loop body
LE: loop exit
PB: predicated region body
PF: predicated region fallthrough
CT: control target
= control target key end

     0   :  { %8 = vsyncpa [#allocation3], 0  ;;  %s1077_s0 = inlined_call_operand.hbm [shape: f32[2,8,8], index: 0, kind: input, shape index: {}]   ;;  %s1078_s1 = inlined_call_operand.hbm [shape: bf16[2,8,32], index: 1, kind: input, shape index: {}]   ;;  %s1079_s2 = inlined_call_operand.hbm [shape: bf16[32,32], index: 2, kind: input, shape index: {}]   ;;  %s1080_s3 = inlined_call_operand.hbm [shape: f32[2,1,32], index: 3, kind: output, shape index: {}]  }
   0x1   :  { %10 = vsyncpa [#allocation3 + $0x1], 0 }
   0x2   :  { %11 = vsyncpa [#allocation6], 0 }
   0x3   :  { %13 = vsyncpa [#allocation6 + $0x1], 0 }
   0x4   :  { %14 = vsyncpa [#allocation4], 0 }
   0x5   :  { %16 = vsyncpa [#allocation4 + $0x1], 0  ;;  %s834_s12 = smov 0   ;;  %s836_s13 = smov 0  }
   0x6   :  { %s838_s14 = smov 0   ;;  %s840_s15 = smov 0  }
   0x7 LB: > { %s855_s16 = sadd.s32 4294967295, %s796_s15   ;;  %s515_s17 = sadd.s32 4294967294, %s796_s15   ;;  %s796_s15 = sphi %s840_s15, %s1102_s15   ;;  %s792_s14 = sphi %s838_s14, %s1101_s14   ;;  %s788_s13 = sphi %s836_s13, %s1100_s13   ;;  %s784_s12 = sphi %s834_s12, %s1099_s12  }
   0x8   : > { %p42_p0 = scmp.ne.s32.totalorder %s788_s13, %s784_s12  ;;  %p1081_p1 = scmp.eq.s32.totalorder %s855_s16, 0 }
   0x9   : > { %p119_p3 = scmp.eq.s32.totalorder %s515_s17, 1  ;;  %p516_p5 = scmp.ge.s32.totalorder %s796_s15, 1 }
   0xa   : > { %p864_p4 = por %p1081_p1, %p42_p0  ;;  %p126_p7 = scmp.lt.s32.totalorder %s796_s15, 3 }
   0xb   : > { %p869_p6 = por %p119_p3, %p42_p0  ;;  %s798_s21 = smov [#allocation7]  }
   0xc   : > { %s1085_s18 = scalar_select %p864_p4, 1, 0 }
   0xd   : > { %s1086_s19 = scalar_select %p869_p6, 1, 0 }
   0xe   : > { %p874_p8 = pnand %p516_p5, %p126_p7  ;;  %s138_s22 = sshll.u32 %s798_s21, 4  ;;  %s878_s22 = int_to_ptr.vmem [resolvable:$true] %s138_s22 }
   0xf   : > { %s890_s24 = sadd.s32 1, %s796_s15   ;;  %s29_s25 = sadd.s32 1, %s792_s14 }
  0x10   : > { %s1087_s20 = scalar_select %p874_p8, 1, 0 }
  0x11   : > { %p555_p9 = pneg %p874_p8  ;;  %s26_s26 = ssub.s32 %s796_s15, %s890_s24 }
  0x12   : > { %s634_s29 = scalar_lea.hbm %s1079_s2, 256 }
  0x13   : > { %p885_p11 = pnand %p555_p9, %p1081_p1  ;;  %p635_p12 = scmp.ne.s32.totalorder %s1079_s2, %s634_s29 }
  0x14   : > { %p641_p5 = scmp.lt.u32.totalorder %s634_s29, %s1079_s2 }
  0x15   : > { %p636_p13 = pneg %p885_p11 }
  0x17   : > { %p637_p0 = pnand %p636_p13, %p635_p12 }
  0x19   : > { %p638_p3 = pneg %p637_p0 }
  0x1b   : > { %p643_p7 = pnand %p641_p5, %p638_p3 }
  0x1d   : > { %646 = shalt.err (!%p643_p7)
}
  0x1e   : > { %s647_s7 = scalar_lea.vmem %s878_s22, 256  ;;  %p655_p2 = scmp.lt.s32.totalorder %s878_s22, %s878_s22 }
  0x1f   : > { %p648_p9 = scmp.ne.s32.totalorder %s878_s22, %s647_s7  ;;  %p656_p6 = scmp.lt.s32.totalorder %s647_s7, %s647_s7 }
  0x21   : > { %p650_p10 = pnand %p648_p9, %p636_p13  ;;  %p657_p4 = por %p656_p6, %p655_p2 }
  0x23   : > { %p651_p1 = pneg %p650_p10 }
  0x25   : > { %p658_p8 = pnand %p657_p4, %p651_p1 }
  0x27   : > { %661 = shalt.err (!%p658_p8)
}
  0x28   : > { %s799_s8 = smov 64   ;;  %s800_s9 = smov 4  }
  0x29   : > { %558 = dma.hbm_to_vmem [thread:$0]  (!%p885_p11), %s1079_s2, 256, %s878_s22, [#allocation6], %s799_s8, %s799_s8, %s800_s9  }
  0x2a   : > { %p27_p1 = scmp.eq.s32.totalorder %s26_s26, 0  ;;  %p36_p2 = scmp.ne.s32.totalorder %s792_s14, %s788_s13 }
  0x2b   : > { %p37_p4 = scmp.eq.s32.totalorder %s796_s15, 0  ;;  %p571_p6 = scmp.lt.s32.totalorder %s796_s15, 2 }
  0x2c   : > { %s921_s17 = scalar_select %p27_p1, %s792_s14, %s29_s25  }
  0x2d   : > { %p38_p8 = por %p37_p4, %p36_p2  ;;  %p1089_p10 = scmp.eq.s32.totalorder %s855_s16, 1 }
  0x2e   : > { %s930_s27 = sand.u32 1, %s792_s14   ;;  %s520_s23 = sshll.u32 %s796_s15, 7 }
  0x2f   : > { %p925_p12 = por %p1089_p10, %p36_p2  ;;  %s519_s28 = sshll.u32 %s930_s27, 3 }
  0x30   : > { %s937_s26 = scalar_lea.hbm %s1077_s0, %s520_s23  ;;  %s156_s25 = scalar_lea.vmem [#allocation2], %s519_s28 }
  0x31   : > { %s1090_s21 = scalar_select %p925_p12, 1, 0 }
  0x32   : > { %s163_s30 = sshll.u32 %s156_s25, 4  ;;  %p939_p11 = pnand %p571_p6, %p38_p8  ;;  %s943_s30 = int_to_ptr.vmem [resolvable:$true] %s163_s30 }
  0x33   : > { %s170_s5 = sand.u32 1, %s796_s15   ;;  %s153_s6 = scalar_lea.sflag [#allocation3], %s930_s27 }
  0x34   : > { %s662_s7 = scalar_lea.hbm %s937_s26, 128  ;;  %p664_p0 = pneg %p939_p11 }
  0x35   : > { %p663_p13 = scmp.ne.s32.totalorder %s937_s26, %s662_s7  ;;  %s667_s10 = scalar_lea.hbm %s1077_s0, 256 }
  0x36   : > { %p668_p7 = scmp.lt.u32.totalorder %s937_s26, %s1077_s0  ;;  %p669_p9 = scmp.lt.u32.totalorder %s667_s10, %s662_s7 }
  0x37   : > { %p665_p3 = pnand %p664_p0, %p663_p13  ;;  %p671_p2 = scmp.lt.u32.totalorder %s662_s7, %s937_s26 }
  0x38   : > { %p670_p1 = por %p669_p9, %p668_p7 }
  0x39   : > { %p666_p5 = pneg %p665_p3 }
  0x3a   : > { %p672_p4 = por %p671_p2, %p670_p1 }
  0x3c   : > { %p673_p6 = pnand %p672_p4, %p666_p5 }
  0x3e   : > { %676 = shalt.err (!%p673_p6)
}
  0x3f   : > { %s677_s28 = scalar_lea.vmem %s943_s30, 128  ;;  %s801_s22 = smov [#allocation2]  }
  0x40   : > { %p678_p8 = scmp.ne.s32.totalorder %s943_s30, %s677_s28  ;;  %s682_s29 = sshll.u32 %s801_s22, 4  ;;  %s683_s29 = int_to_ptr.vmem [resolvable:$false] %s682_s29 }
  0x41   : > { %s684_s25 = scalar_lea.vmem %s683_s29, 256  ;;  %p685_p3 = scmp.lt.s32.totalorder %s943_s30, %s683_s29 }
  0x42   : > { %p680_p10 = pnand %p678_p8, %p664_p0  ;;  %p686_p7 = scmp.lt.s32.totalorder %s684_s25, %s677_s28 }
  0x44   : > { %p681_p13 = pneg %p680_p10  ;;  %p687_p9 = por %p686_p7, %p685_p3 }
  0x46   : > { %p688_p1 = pnand %p687_p9, %p681_p13 }
  0x48   : > { %691 = shalt.err (!%p688_p1)
}
  0x49   : > { %562 = dma.hbm_to_vmem [thread:$0]  (!%p939_p11), %s937_s26, 128, %s943_s30, %s153_s6  }
  0x4a   : > { %s521_s7 = sshll.u32 %s930_s27, 2  ;;  %s522_s8 = sshll.u32 %s796_s15, 6 }
  0x4b   : > { %s977_s11 = scalar_lea.hbm %s1078_s1, %s522_s8  ;;  %s174_s23 = scalar_lea.vmem [#allocation5], %s521_s7 }
  0x4c   : > { %s181_s28 = sshll.u32 %s174_s23, 4  ;;  %s171_s22 = scalar_lea.sflag [#allocation6], %s170_s5  ;;  %s182_s28 = int_to_ptr.vmem [resolvable:$true] %s181_s28 }
  0x4d   : > { %s692_s29 = scalar_lea.hbm %s977_s11, 64  ;;  %s697_s30 = scalar_lea.hbm %s1078_s1, 128 }
  0x4e   : > { %p693_p5 = scmp.ne.s32.totalorder %s977_s11, %s692_s29  ;;  %p698_p6 = scmp.lt.u32.totalorder %s977_s11, %s1078_s1 }
  0x4f   : > { %p699_p8 = scmp.lt.u32.totalorder %s697_s30, %s692_s29  ;;  %p701_p13 = scmp.lt.u32.totalorder %s692_s29, %s977_s11 }
  0x50   : > { %p695_p2 = pnand %p693_p5, %p664_p0 }
  0x51   : > { %p700_p10 = por %p699_p8, %p698_p6 }
  0x52   : > { %p696_p4 = pneg %p695_p2 }
  0x53   : > { %p702_p3 = por %p701_p13, %p700_p10 }
  0x55   : > { %p703_p7 = pnand %p702_p3, %p696_p4 }
  0x57   : > { %706 = shalt.err (!%p703_p7)
}
  0x58   : > { %s707_s5 = scalar_lea.vmem %s182_s28, 64  ;;  %s802_s7 = smov [#allocation5]  }
  0x59   : > { %p708_p9 = scmp.ne.s32.totalorder %s182_s28, %s707_s5  ;;  %s712_s8 = sshll.u32 %s802_s7, 4  ;;  %s713_s8 = int_to_ptr.vmem [resolvable:$false] %s712_s8 }
  0x5a   : > { %s714_s9 = scalar_lea.vmem %s713_s8, 128  ;;  %p715_p2 = scmp.lt.s32.totalorder %s182_s28, %s713_s8 }
  0x5b   : > { %p710_p1 = pnand %p708_p9, %p664_p0  ;;  %p716_p12 = scmp.lt.s32.totalorder %s714_s9, %s707_s5 }
  0x5d   : > { %p711_p5 = pneg %p710_p1  ;;  %p717_p6 = por %p716_p12, %p715_p2 }
  0x5f   : > { %p718_p8 = pnand %p717_p6, %p711_p5 }
  0x61   : > { %721 = shalt.err (!%p718_p8)
}
  0x62   : > { %565 = dma.hbm_to_vmem [thread:$0]  (!%p939_p11), %s977_s11, 64, %s182_s28, %s171_s22  }
  0x63   : > { %p1092_p4 = scmp.ne.s32.totalorder %s1087_s20, 0 }
  0x64   : > { %s1003_s10 = sand.u32 (!%p1092_p4), 1, %s788_s13   ;;  %p1093_p0 = scmp.ne.s32.totalorder (!%p1092_p4), %s1085_s18, 0 }
  0x65   : > { %190 = sbr.rel (%p1092_p4) target bundleno = 536 (0x218), region = 32  ;;  %s524_s23 = sshll.u32 (!%p1092_p4), %s1003_s10, 3 }
  0x66   : > { %s193_s29 = scalar_lea.sflag (!%p1092_p4), [#allocation3], %s1003_s10  ;;  %s196_s27 = scalar_lea.vmem (!%p1092_p4), [#allocation2], %s524_s23 }
  0x6c   : > { %767 = dma.done.wait (%p1093_p0), %s193_s29, 128  }
  0x6d   : > { %769 = vsyncadd (%p1093_p0), %s193_s29, 4294967168  ;;  %s201_s4 = sand.u32 1, %s855_s16   ;;  %s525_s20 = sshll.u32 %s1003_s10, 2 }
  0x6e   : > { %s202_s11 = scalar_lea.sflag [#allocation6], %s201_s4  ;;  %s1013_s28 = scalar_lea.vmem [#allocation5], %s525_s20 }
  0x6f   : > { %771 = dma.done.wait (%p1093_p0), %s202_s11, 64  }
  0x70   : > { %773 = vsyncadd (%p1093_p0), %s202_s11, 4294967232  ;;  %p1094_p12 = scmp.eq.s32.totalorder %s855_s16, 0 }
  0x72   : > { %775 = dma.done.wait (%p1094_p12), [#allocation6], 256   ;;  %p1095_p11 = pmov %p1094_p12 }
  0x73   : > { %v803_v0 = vmov 2   ;;  %v804_v1 = vmov 0   ;;  %v241_v2 = vld [vmem:[%s196_s27] sm:$0xff]  ;;  %v805_v3 = vmov 3   ;;  %v806_v4 = vmov 1   ;;  %v628_v9 = vld [vmem:[#allocation7] sm:$0xff]  }
  0x74   : > { %777 = vsyncadd (%p1095_p11), [#allocation6], 4294967040  ;;  %621 = vset.pattern.permute.xlu1 %v803_v0  ;;  %619 = vset.pattern.permute.xlu0 %v804_v1  ;;  %v807_v5 = vmov 4   ;;  %v808_v6 = vmov 5   ;;  %v809_v7 = vmov 6   ;;  %v810_v8 = vmov 7  }
  0x75   : > { %266 = vperm.xlu1 %621, %v241_v2   ;;  %246 = vperm.xlu0 %619, %v241_v2   ;;  %v811_v10 = vmov 0.0   ;;  %v629_v11 = vld [vmem:[#allocation7 + $0x8] sm:$0xff]   ;;  %vm812_vm0 = vmmov 0   ;;  %v249_v12 = vlaneseq  ;;  %v242_v14 = vld [vmem:[%s1013_s28] sm:$0xf]  ;;  %vm338_vm1 = vcmask 261120  }
  0x76   : > { %537 = vmatprep.subr.bf16.mxu0 %v811_v10  ;;  %541 = vmatprep.mubr.msk.bf16.mxu0 %vm812_vm0, %v811_v10  ;;  %v243_v17 = vunpack.c.l.bf16 %v242_v14  ;;  %s531_s18 = sshll.u32 %s855_s16, 4  ;;  %s235_s22 = scalar_lea.vmem [#allocation8], %s1003_s10  ;;  %vm402_vm3 = vcmask 253952  }
  0x77   : > { %538 = vmatpush3.bf16.msra.mxu0 %v628_v9  ;;  %v250_v13 = vshrl.u32 %v249_v12, 7  ;;  %s417_s26 = sshll.u32 %s235_s22, 4  ;;  %s1033_s25 = scalar_lea.hbm %s1080_s3, %s531_s18  ;;  %s1035_s26 = int_to_ptr.vmem [resolvable:$true] %s417_s26 }
  0x78   : > { %539 = vmatprep.subr.bf16.mxu0 %v811_v10  ;;  %s405_s5 = scalar_lea.sflag [#allocation4], %s1003_s10  ;;  %s722_s7 = scalar_lea.vmem %s1035_s26, 16 }
  0x79   : > { %622 = vset.pattern.permute.xlu1 %v805_v3  ;;  %620 = vset.pattern.permute.xlu0 %v806_v4  ;;  %v251_v15 = vsub.s32 0, %v250_v13  ;;  %v261_v16 = vsub.s32 1, %v250_v13  ;;  %v271_v18 = vsub.s32 2, %v250_v13  ;;  %v281_v22 = vsub.s32 3, %v250_v13  ;;  %p723_p10 = scmp.ne.s32.totalorder %s1035_s26, %s722_s7  ;;  %p1096_p13 = scmp.ne.s32.totalorder %s1090_s21, 0 }
  0x7a   : > { %276 = vperm.xlu1 %622, %v241_v2   ;;  %256 = vperm.xlu0 %620, %v241_v2   ;;  %v291_v24 = vsub.s32 4, %v250_v13  ;;  %v301_v28 = vsub.s32 5, %v250_v13  ;;  %v311_v36 = vsub.s32 6, %v250_v13  ;;  %v321_v45 = vsub.s32 7, %v250_v13  ;;  %s813_s16 = smov [#allocation8]  }
  0x7b   : > { %540 = vmatpush3.bf16.msra.mxu0 %v629_v11  ;;  %v252_v21 = vrot.slane %v243_v17, %v251_v15  ;;  %v262_v23 = vrot.slane %v243_v17, %v261_v16  ;;  %v272_v25 = vrot.slane %v243_v17, %v271_v18  ;;  %v282_v30 = vrot.slane %v243_v17, %v281_v22  ;;  %p724_p3 = pnand %p723_p10, %p1096_p13  ;;  %s726_s8 = sshll.u32 %s813_s16, 4  ;;  %s727_s8 = int_to_ptr.vmem [resolvable:$false] %s726_s8 }
  0x7c   : > { %v292_v32 = vrot.slane %v243_v17, %v291_v24  ;;  %v302_v35 = vrot.slane %v243_v17, %v301_v28  ;;  %v312_v44 = vrot.slane %v243_v17, %v311_v36  ;;  %v322_v50 = vrot.slane %v243_v17, %v321_v45  ;;  %s728_s9 = scalar_lea.vmem %s727_s8, 32  ;;  %p729_p9 = scmp.lt.s32.totalorder %s1035_s26, %s727_s8 }
  0x7d   : > { %p725_p7 = pneg %p724_p3  ;;  %p730_p1 = scmp.lt.s32.totalorder %s728_s9, %s722_s7 }
  0x7e   : > { %623 = vset.pattern.permute.xlu1 %v807_v5  ;;  %624 = vset.pattern.permute.xlu0 %v808_v6 }
  0x7f   : > { %286 = vperm.xlu1 %623, %v241_v2   ;;  %296 = vperm.xlu0 %624, %v241_v2   ;;  %p731_p5 = por %p730_p1, %p729_p9 }
  0x81   : > { %p732_p2 = pnand %p731_p5, %p725_p7 }
  0x83   : > { %625 = vset.pattern.permute.xlu1 %v809_v7  ;;  %627 = vset.pattern.permute.xlu0 %v810_v8 }
  0x84   : > { %306 = vperm.xlu1 %625, %v241_v2  }
  0x88   : > { %626 = vset.pattern.permute.xlu1 %v810_v8 }
  0x89   : > { %316 = vperm.xlu1 %626, %v241_v2  }
  0xf4   : > { %v267_v19 = vpop.permute.xlu1 %266  ;;  %v247_v20 = vpop.permute.xlu0 %246 }
  0xf5   : > { %v253_v29 = vmul.f32 %v252_v21, %v247_v20  ;;  %v273_v33 = vmul.f32 %v272_v25, %v267_v19 }
  0xf9   : > { %v277_v26 = vpop.permute.xlu1 %276  ;;  %v257_v27 = vpop.permute.xlu0 %256 }
  0xfa   : > { %v263_v31 = vmul.f32 %v262_v23, %v257_v27  ;;  %v283_v37 = vmul.f32 %v282_v30, %v277_v26 }
  0xfc   : > { %v264_v34 = vadd.f32 %v263_v31, %v253_v29 }
  0xfe   : > { %v274_v38 = vadd.f32 %v273_v33, %v264_v34  ;;  %v287_v39 = vpop.permute.xlu1 %286  ;;  %v297_v40 = vpop.permute.xlu0 %296 }
  0xff   : > { %v293_v41 = vmul.f32 %v292_v32, %v287_v39  ;;  %v303_v43 = vmul.f32 %v302_v35, %v297_v40 }
 0x100   : > { %v284_v42 = vadd.f32 %v283_v37, %v274_v38 }
 0x102   : > { %v294_v46 = vadd.f32 %v293_v41, %v284_v42 }
 0x103   : > { %v307_v47 = vpop.permute.xlu1 %306 }
 0x104   : > { %v304_v48 = vadd.f32 %v303_v43, %v294_v46  ;;  %v313_v49 = vmul.f32 %v312_v44, %v307_v47 }
 0x106   : > { %v314_v52 = vadd.f32 %v313_v49, %v304_v48 }
 0x108   : > { %v317_v51 = vpop.permute.xlu1 %316 }
 0x109   : > { %v323_v53 = vmul.f32 %v322_v50, %v317_v51 }
 0x10b   : > { %v324_v54 = vadd.f32 %v323_v53, %v314_v52 }
 0x10d   : > { %v325_v55 = vpack.c.bf16 %v324_v54, %v324_v54 }
 0x10f   : > { %542 = vmatmul.mubr.msk.bf16.vlgmr.msra.gmra.mrb[0].mxu0 %vm338_vm1, %v325_v55 }
 0x1e2   : > { %v376_v56 = vpop.f32.mrb[0].mxu0 }
 0x1e3   : > { %630 = vtanh.f32 %v376_v56  ;;  %v543_v57 = vpop.f32.mrb[1].mxu0 }
 0x1e4   : > { %v379_v58 = vpop.f32.mrb[2].mxu0 }
 0x1e5   : > { %v544_v59 = vpop.f32.mrb[3].mxu0 }
 0x1ed   : > { %v631_v60 = vpop.eup %630 }
 0x1ee   : > { %vm383_vm2 = vcmp.ne.f32.partialorder %v631_v60, 0.0  ;;  %v393_v62 = vsel %vm338_vm1, %v631_v60, 0.0 }
 0x1ef   : > { %v530_v61 = vsel %vm383_vm2, 1.0, %v811_v10  ;;  %v394_v1 = vrot.slane %v393_v62, 4 }
 0x1f0   : > { %v386_v63 = vsel %vm338_vm1, %v530_v61, 0.0 }
 0x1f1   : > { %v387_v0 = vrot.slane %v386_v63, 4  ;;  %v395_v4 = vadd.f32 %v394_v1, %v393_v62 }
 0x1f3   : > { %v388_v2 = vadd.f32 %v387_v0, %v386_v63  ;;  %v396_v7 = vrot.slane %v395_v4, 2 }
 0x1f5   : > { %v389_v3 = vrot.slane %v388_v2, 2  ;;  %v397_v9 = vadd.f32 %v396_v7, %v395_v4 }
 0x1f7   : > { %v390_v5 = vadd.f32 %v389_v3, %v388_v2  ;;  %v398_v11 = vrot.slane %v397_v9, 1 }
 0x1f9   : > { %v391_v6 = vrot.slane %v390_v5, 1  ;;  %v399_v10 = vadd.f32 %v398_v11, %v397_v9 }
 0x1fb   : > { %v392_v8 = vadd.f32 %v391_v6, %v390_v5 }
 0x1fd   : > { %632 = vrcp.f32 %v392_v8 }
 0x207   : > { %v633_v12 = vpop.eup %632 }
 0x208   : > { %v401_v13 = vmul.f32 %v633_v12, %v399_v10 }
 0x20a   : > { %403 = vst.msk [vmem:[%s235_s22] sm:$0x1] %vm402_vm3, %v401_v13 }
 0x20b   : > { %735 = shalt.err (!%p732_p2)
}
 0x20c   : > { %s736_s10 = scalar_lea.hbm %s1033_s25, 16  ;;  %s740_s27 = scalar_lea.hbm %s1080_s3, 32 }
 0x20d   : > { %p737_p6 = scmp.ne.s32.totalorder %s1033_s25, %s736_s10  ;;  %p741_p0 = scmp.lt.u32.totalorder %s1033_s25, %s1080_s3 }
 0x20e   : > { %p742_p12 = scmp.lt.u32.totalorder %s740_s27, %s736_s10  ;;  %p744_p10 = scmp.lt.u32.totalorder %s736_s10, %s1033_s25 }
 0x20f   : > { %p738_p8 = pnand %p737_p6, %p1096_p13 }
 0x210   : > { %p743_p11 = por %p742_p12, %p741_p0 }
 0x211   : > { %p739_p4 = pneg %p738_p8 }
 0x212   : > { %p745_p3 = por %p744_p10, %p743_p11 }
 0x214   : > { %p746_p7 = pnand %p745_p3, %p739_p4 }
 0x216   : > { %749 = shalt.err (!%p746_p7)
}
 0x217   : > { %553 = dma.vmem_to_hbm [thread:$0]  (%p1096_p13), %s1035_s26, 16, %s1033_s25, %s405_s5  }
 0x218 PF: > { %s429_s11 = sand.u32 1, %s784_s12   ;;  %p1097_p9 = scmp.ne.s32.totalorder %s1086_s19, 0 }
 0x219   : > { %p1098_p1 = scmp.ge.s32.totalorder %s796_s15, 2  ;;  %s430_s28 = scalar_lea.sflag [#allocation4], %s429_s11 }
 0x21b   : > { %p567_p5 = pnand %p1098_p1, %p1097_p9 }
 0x21d   : > { %779 = dma.done.wait (!%p567_p5), %s430_s28, 16  }
 0x21e   : > { %781 = vsyncadd (!%p567_p5), %s430_s28, 4294967280  ;;  %p19_p2 = scmp.ge.s32.totalorder %s890_s24, 4   ;;  %s1099_s12 = smov %s788_s13 }
 0x21f   : > { %s1100_s13 = smov %s792_s14  ;;  %s1101_s14 = smov %s921_s17 }
 0x220   : > { %s1102_s15 = smov %s890_s24  ;;  %21 = sbr.rel (!%p19_p2) target bundleno = 7 (0x7), region = 94 }
 0x227   :  { %434 = vsyncpa [#allocation3], 1 }
 0x228   :  { %436 = vsyncpa [#allocation3 + $0x1], 1 }
 0x229   :  { %437 = vsyncpa [#allocation6], 1 }
 0x22a   :  { %439 = vsyncpa [#allocation6 + $0x1], 1 }
 0x22b   :  { %440 = vsyncpa [#allocation4], 1 }
 0x22c   :  { %442 = vsyncpa [#allocation4 + $0x1], 1 }

</bundles_post_ra>
